<compile_context>
chip_gen: v7x
topology: tpu7x:2x2x1
jax: 0.10.0
libtpu: 0.0.40
codegen_flags: <defaults>
</compile_context>

<pallas_src>
import functools

import jax
import jax.numpy as jnp
from jax.experimental import pallas as pl
from jax.experimental.pallas import tpu as pltpu


def _icb_kernel(x_ref, wall_ref, w3_ref, b1_ref, b2_ref, b3_ref,
                mask_l_ref, mask_r_ref, o_ref, *,
                tb_per_step, mm_dtype, mm_precision):
    H = b1_ref.shape[0]
    L = x_ref.shape[-1]
    # Static unroll over the batches handled by this grid step (tb_per_step is small).
    for tb in range(tb_per_step):
        # In-kernel cast of the (Cp, L) tile to the MXU dtype (no wrapper HBM pass).
        x = x_ref[tb].astype(mm_dtype)                                   # (Cp, L)

        # One fused MXU call: rows [W1; W2_tap0; W2_tap1; W2_tap2].
        y = jnp.dot(wall_ref[...], x,
                    preferred_element_type=jnp.float32,
                    precision=mm_precision)                              # (4H, L) f32

        # conv1 (1x1).
        x1 = y[0:H] + b1_ref[...]                                        # (H, L)

        # conv2 (k=3, pad=1): shift per-tap outputs along L (roll on XLU) and zero the
        # boundary column via a precomputed (1, L) mask multiply.
        t0 = y[H:2 * H]          # multiplies x[l-1]
        t1 = y[2 * H:3 * H]      # multiplies x[l]
        t2 = y[3 * H:4 * H]      # multiplies x[l+1]
        t0s = pltpu.roll(t0, shift=1, axis=1) * mask_l_ref[...]          # t0[l-1], 0 at l=0
        t2s = pltpu.roll(t2, shift=L - 1, axis=1) * mask_r_ref[...]      # t2[l+1], 0 at l=L-1
        x2 = t0s + t1 + t2s + b2_ref[...]                                # (H, L)

        # Gating (dropout identity in eval mode), f32 on the VPU.
        z = x1 * jnp.maximum(x2, 0.0) + x2 * jnp.maximum(x1, 0.0)        # (H, L)

        # conv3 (1x1) back to Cp channels; lane-dense (Cp, L) store.
        out = jnp.dot(w3_ref[...], z.astype(mm_dtype),
                      preferred_element_type=jnp.float32,
                      precision=mm_precision) + b3_ref[...]              # (Cp, L)
        o_ref[tb] = out.astype(o_ref.dtype)


def _pick_tb(B, per_batch_bytes):
    """Batches per grid step: keep >= 2 grid steps (v7x: 2 TCs) and a modest VMEM footprint."""
    budget = 16 * 1024 * 1024
    target = max(1, B // 2)
    target = min(target, max(1, budget // max(per_batch_bytes, 1)))
    for tb in range(int(target), 0, -1):
        if B % tb == 0:
            return tb
    return 1


def icb_forward(x_ncl, params, *, mm_dtype=jnp.bfloat16, out_dtype=None, batch_per_step=None):
    """x_ncl: (B, C, L) PyTorch NCL layout (kept native, no wrapper transposes).

    params (PyTorch conv shapes, squeezed):
      w1: (H, C)      b1: (H,)
      w2: (H, C, 3)   b2: (H,)
      w3: (C, H)      b3: (C,)
    """
    w1, b1, w2, b2, w3, b3 = params
    B, C, L = x_ncl.shape
    H = w1.shape[0]

    mm_dtype = jnp.dtype(mm_dtype)
    out_dtype = jnp.dtype(x_ncl.dtype if out_dtype is None else out_dtype)
    mm_precision = (jax.lax.Precision.HIGHEST if mm_dtype == jnp.dtype(jnp.float32)
                    else jax.lax.Precision.DEFAULT)

    # Pad channels to a multiple of 8 so in/out tiles are full (8, 128) vreg tiles.
    Cp = ((C + 7) // 8) * 8
    x_p = jnp.pad(x_ncl, ((0, 0), (0, Cp - C), (0, 0))) if Cp != C else x_ncl

    # Fuse conv1 + the three conv2 taps into one (4H, Cp) weight -> one MXU call.
    w_all = jnp.concatenate([w1, w2[:, :, 0], w2[:, :, 1], w2[:, :, 2]], axis=0)
    if Cp != C:
        w_all = jnp.pad(w_all, ((0, 0), (0, Cp - C)))
        w3_p = jnp.pad(w3, ((0, Cp - C), (0, 0)))
        b3_p = jnp.pad(b3, (0, Cp - C))
    else:
        w3_p, b3_p = w3, b3

    w_all = w_all.astype(mm_dtype)            # (4H, Cp)  small constants; wrapper cast OK
    w3_m = w3_p.astype(mm_dtype)              # (Cp, H)
    b1_2d = b1.reshape(H, 1).astype(jnp.float32)
    b2_2d = b2.reshape(H, 1).astype(jnp.float32)
    b3_2d = b3_p.reshape(Cp, 1).astype(jnp.float32)

    # Precomputed conv2 boundary masks (replace per-step iota + where).
    lane = jnp.arange(L, dtype=jnp.int32)
    mask_l = (lane > 0).astype(jnp.float32).reshape(1, L)
    mask_r = (lane < L - 1).astype(jnp.float32).reshape(1, L)

    # Batches per grid step.
    per_batch_bytes = (Cp * L * (2 * x_p.dtype.itemsize + 2 * out_dtype.itemsize)
                       + 2 * 4 * H * L * 4)   # in/out double-buffered + f32 temporaries
    if batch_per_step is None:
        tb_per_step = _pick_tb(B, per_batch_bytes)
    else:
        tb_per_step = int(batch_per_step)
        if B % tb_per_step != 0:
            raise ValueError("batch_per_step must divide B")
    grid_b = B // tb_per_step

    # Explicit scoped-VMEM limit with headroom (default scoped limit binds first otherwise).
    const_bytes = ((4 * H * Cp + Cp * H) * mm_dtype.itemsize + (2 * H + Cp + 2 * L) * 4)
    est = tb_per_step * per_batch_bytes + const_bytes + 3 * 4 * H * L * 4
    vmem_limit = int(min(64 * 1024 * 1024, max(32 * 1024 * 1024, 4 * est)))

    kernel = functools.partial(_icb_kernel, tb_per_step=tb_per_step,
                               mm_dtype=mm_dtype, mm_precision=mm_precision)

    out = pl.pallas_call(
        kernel,
        out_shape=jax.ShapeDtypeStruct((B, Cp, L), out_dtype),
        grid_spec=pltpu.PrefetchScalarGridSpec(
            num_scalar_prefetch=0,
            grid=(grid_b,),
            in_specs=[
                # x: tb_per_step batch elements per grid step, pipelined/double-buffered.
                pl.BlockSpec((tb_per_step, Cp, L), lambda g: (g, 0, 0)),
                # Constants: full-array VMEM residents (no double-buffering).
                pl.BlockSpec(memory_space=pltpu.MemorySpace.VMEM),   # w_all  (4H, Cp)
                pl.BlockSpec(memory_space=pltpu.MemorySpace.VMEM),   # w3     (Cp, H)
                pl.BlockSpec(memory_space=pltpu.MemorySpace.VMEM),   # b1     (H, 1)
                pl.BlockSpec(memory_space=pltpu.MemorySpace.VMEM),   # b2     (H, 1)
                pl.BlockSpec(memory_space=pltpu.MemorySpace.VMEM),   # b3     (Cp, 1)
                pl.BlockSpec(memory_space=pltpu.MemorySpace.VMEM),   # mask_l (1, L)
                pl.BlockSpec(memory_space=pltpu.MemorySpace.VMEM),   # mask_r (1, L)
            ],
            out_specs=pl.BlockSpec((tb_per_step, Cp, L), lambda g: (g, 0, 0)),
        ),
        compiler_params=pltpu.CompilerParams(
            dimension_semantics=("parallel",),
            vmem_limit_bytes=vmem_limit),
    )(x_p, w_all, w3_m, b1_2d, b2_2d, b3_2d, mask_l, mask_r)

    return out[:, :C, :] if Cp != C else out


def icb_reference(x, params):
    """Pure-JAX f32 reference of the PyTorch forward (eval mode), NCL layout."""
    w1, b1, w2, b2, w3, b3 = params
    p = "highest"
    x1 = jnp.einsum("hc,bcl->bhl", w1, x, precision=p) + b1[None, :, None]
    xp = jnp.pad(x, ((0, 0), (0, 0), (1, 1)))
    x2 = (jnp.einsum("hc,bcl->bhl", w2[:, :, 0], xp[:, :, :-2], precision=p)
          + jnp.einsum("hc,bcl->bhl", w2[:, :, 1], xp[:, :, 1:-1], precision=p)
          + jnp.einsum("hc,bcl->bhl", w2[:, :, 2], xp[:, :, 2:], precision=p)
          + b2[None, :, None])
    out1 = x1 * jax.nn.relu(x2)
    out2 = x2 * jax.nn.relu(x1)
    return jnp.einsum("ch,bhl->bcl", w3, out1 + out2, precision=p) + b3[None, :, None]


if __name__ == "__main__":
    # batch, in_features, hidden_features, seq_len (L multiple of 128 -> lane-dense).
    B, C_in, H, L = 2, 4, 32, 128

    key = jax.random.PRNGKey(0)
    kx, k1, k2, k3, k4, k5, k6 = jax.random.split(key, 7)

    x = jax.random.normal(kx, (B, C_in, L), dtype=jnp.float32)   # PyTorch NCL input

    # PyTorch-shaped parameters: conv1.weight (H,C,1)->(H,C); conv2.weight (H,C,3);
    # conv3.weight (C,H,1)->(C,H).
    w1 = jax.random.normal(k1, (H, C_in), dtype=jnp.float32) * 0.1
    b1 = jax.random.normal(k2, (H,), dtype=jnp.float32) * 0.1
    w2 = jax.random.normal(k3, (H, C_in, 3), dtype=jnp.float32) * 0.1
    b2 = jax.random.normal(k4, (H,), dtype=jnp.float32) * 0.1
    w3 = jax.random.normal(k5, (C_in, H), dtype=jnp.float32) * 0.1
    b3 = jax.random.normal(k6, (C_in,), dtype=jnp.float32) * 0.1
    params = (w1, b1, w2, b2, w3, b3)

    ref = icb_reference(x, params)

    # f32 matmul path (faithful to the module's math).
    out_f32 = jax.block_until_ready(icb_forward(x, params, mm_dtype=jnp.float32))
    assert out_f32.shape == (B, C_in, L)
    assert jnp.allclose(out_f32, ref, atol=5e-3, rtol=5e-3), "f32 kernel mismatch vs reference"

    # Default path: bf16 matmul inputs (cast in-kernel), f32 accumulation/gating, f32 out.
    out_bf = jax.block_until_ready(icb_forward(x, params))
    assert out_bf.shape == (B, C_in, L)
    assert jnp.allclose(out_bf, ref, atol=3e-2, rtol=3e-2), "bf16 kernel mismatch vs reference"

    # bf16-output variant (halves write-back bytes on all generations).
    out_bf16o = jax.block_until_ready(icb_forward(x, params, out_dtype=jnp.bfloat16))
    assert out_bf16o.dtype == jnp.bfloat16
    assert jnp.allclose(out_bf16o.astype(jnp.float32), ref, atol=6e-2, rtol=6e-2), \
        "bf16-out kernel mismatch vs reference"

    print("KERNEL_OK")
</pallas_src>

<mosaic_0001>
module attributes {stable_mosaic.version = 11 : i64} {
  func.func @_icb_kernel(%arg0: i32, %arg1: memref<1x8x128xf32, #tpu.memory_space<vmem>>, %arg2: memref<128x8xf32, #tpu.memory_space<vmem>>, %arg3: memref<8x32xf32, #tpu.memory_space<vmem>>, %arg4: memref<32x1xf32, #tpu.memory_space<vmem>>, %arg5: memref<32x1xf32, #tpu.memory_space<vmem>>, %arg6: memref<8x1xf32, #tpu.memory_space<vmem>>, %arg7: memref<1x128xf32, #tpu.memory_space<vmem>>, %arg8: memref<1x128xf32, #tpu.memory_space<vmem>>, %arg9: memref<1x8x128xf32, #tpu.memory_space<vmem>>) attributes {dimension_semantics = [#tpu.dimension_semantics<parallel>], iteration_bounds = array<i64: 2>, scalar_prefetch = 0 : i64, scratch_operands = 0 : i64, tpu.core_type = #tpu.core_type<tc>, window_params = [{transform_indices = @transform_0, window_bounds = array<i64: 1, 8, 128>}, {pipeline_mode = #tpu.pipeline_mode<synchronous>, transform_indices = @transform_1, window_bounds = array<i64: 128, 8>}, {pipeline_mode = #tpu.pipeline_mode<synchronous>, transform_indices = @transform_2, window_bounds = array<i64: 8, 32>}, {pipeline_mode = #tpu.pipeline_mode<synchronous>, transform_indices = @transform_3, window_bounds = array<i64: 32, 1>}, {pipeline_mode = #tpu.pipeline_mode<synchronous>, transform_indices = @transform_4, window_bounds = array<i64: 32, 1>}, {pipeline_mode = #tpu.pipeline_mode<synchronous>, transform_indices = @transform_5, window_bounds = array<i64: 8, 1>}, {pipeline_mode = #tpu.pipeline_mode<synchronous>, transform_indices = @transform_6, window_bounds = array<i64: 1, 128>}, {pipeline_mode = #tpu.pipeline_mode<synchronous>, transform_indices = @transform_7, window_bounds = array<i64: 1, 128>}, {transform_indices = @transform_8, window_bounds = array<i64: 1, 8, 128>}]} {
    %c0 = arith.constant 0 : index
    %c0_0 = arith.constant 0 : index
    %c0_1 = arith.constant 0 : index
    %0 = vector.load %arg1[%c0, %c0_0, %c0_1] : memref<1x8x128xf32, #tpu.memory_space<vmem>>, vector<1x8x128xf32>
    %1 = vector.shape_cast %0 : vector<1x8x128xf32> to vector<8x128xf32>
    %c0_2 = arith.constant 0 : index
    %c0_3 = arith.constant 0 : index
    %2 = vector.load %arg2[%c0_2, %c0_3] : memref<128x8xf32, #tpu.memory_space<vmem>>, vector<128x8xf32>
    %cst = arith.constant dense<0.000000e+00> : vector<128x128xf32>
    %3 = tpu.matmul %2, %1, %cst {dimension_numbers = #tpu.dot_dimension_numbers<[1], [0], [0], [1], [0, 0, 1, 1], [], []>, precision = #tpu.contract_precision<fp32>} : vector<128x8xf32>, vector<8x128xf32>, vector<128x128xf32> -> vector<128x128xf32>
    %4 = vector.extract_strided_slice %3 {offsets = [0, 0], sizes = [32, 128], strides = [1, 1]} : vector<128x128xf32> to vector<32x128xf32>
    %c0_4 = arith.constant 0 : index
    %c0_5 = arith.constant 0 : index
    %5 = vector.load %arg4[%c0_4, %c0_5] : memref<32x1xf32, #tpu.memory_space<vmem>>, vector<32x1xf32>
    %6 = vector.broadcast %5 : vector<32x1xf32> to vector<32x128xf32>
    %7 = arith.addf %4, %6 : vector<32x128xf32>
    %8 = vector.extract_strided_slice %3 {offsets = [32, 0], sizes = [32, 128], strides = [1, 1]} : vector<128x128xf32> to vector<32x128xf32>
    %9 = vector.extract_strided_slice %3 {offsets = [64, 0], sizes = [32, 128], strides = [1, 1]} : vector<128x128xf32> to vector<32x128xf32>
    %10 = vector.extract_strided_slice %3 {offsets = [96, 0], sizes = [32, 128], strides = [1, 1]} : vector<128x128xf32> to vector<32x128xf32>
    %c1_i32 = arith.constant 1 : i32
    %11 = tpu.dynamic_rotate %8 by %c1_i32 dim 1 : vector<32x128xf32>, i32 -> vector<32x128xf32>
    %c0_6 = arith.constant 0 : index
    %c0_7 = arith.constant 0 : index
    %12 = vector.load %arg7[%c0_6, %c0_7] : memref<1x128xf32, #tpu.memory_space<vmem>>, vector<1x128xf32>
    %13 = vector.broadcast %12 : vector<1x128xf32> to vector<32x128xf32>
    %14 = arith.mulf %11, %13 : vector<32x128xf32>
    %c127_i32 = arith.constant 127 : i32
    %15 = tpu.dynamic_rotate %10 by %c127_i32 dim 1 : vector<32x128xf32>, i32 -> vector<32x128xf32>
    %c0_8 = arith.constant 0 : index
    %c0_9 = arith.constant 0 : index
    %16 = vector.load %arg8[%c0_8, %c0_9] : memref<1x128xf32, #tpu.memory_space<vmem>>, vector<1x128xf32>
    %17 = vector.broadcast %16 : vector<1x128xf32> to vector<32x128xf32>
    %18 = arith.mulf %15, %17 : vector<32x128xf32>
    %19 = arith.addf %14, %9 : vector<32x128xf32>
    %20 = arith.addf %19, %18 : vector<32x128xf32>
    %c0_10 = arith.constant 0 : index
    %c0_11 = arith.constant 0 : index
    %21 = vector.load %arg5[%c0_10, %c0_11] : memref<32x1xf32, #tpu.memory_space<vmem>>, vector<32x1xf32>
    %22 = vector.broadcast %21 : vector<32x1xf32> to vector<32x128xf32>
    %23 = arith.addf %20, %22 : vector<32x128xf32>
    %cst_12 = arith.constant 0.000000e+00 : f32
    %24 = vector.broadcast %cst_12 : f32 to vector<32x128xf32>
    %25 = arith.maximumf %23, %24 : vector<32x128xf32>
    %26 = arith.mulf %7, %25 : vector<32x128xf32>
    %cst_13 = arith.constant 0.000000e+00 : f32
    %27 = vector.broadcast %cst_13 : f32 to vector<32x128xf32>
    %28 = arith.maximumf %7, %27 : vector<32x128xf32>
    %29 = arith.mulf %23, %28 : vector<32x128xf32>
    %30 = arith.addf %26, %29 : vector<32x128xf32>
    %c0_14 = arith.constant 0 : index
    %c0_15 = arith.constant 0 : index
    %31 = vector.load %arg3[%c0_14, %c0_15] : memref<8x32xf32, #tpu.memory_space<vmem>>, vector<8x32xf32>
    %cst_16 = arith.constant dense<0.000000e+00> : vector<8x128xf32>
    %32 = tpu.matmul %31, %30, %cst_16 {dimension_numbers = #tpu.dot_dimension_numbers<[1], [0], [0], [1], [0, 0, 1, 1], [], []>, precision = #tpu.contract_precision<fp32>} : vector<8x32xf32>, vector<32x128xf32>, vector<8x128xf32> -> vector<8x128xf32>
    %c0_17 = arith.constant 0 : index
    %c0_18 = arith.constant 0 : index
    %33 = vector.load %arg6[%c0_17, %c0_18] : memref<8x1xf32, #tpu.memory_space<vmem>>, vector<8x1xf32>
    %34 = vector.broadcast %33 : vector<8x1xf32> to vector<8x128xf32>
    %35 = arith.addf %32, %34 : vector<8x128xf32>
    %c0_19 = arith.constant 0 : index
    %c0_20 = arith.constant 0 : index
    %c0_21 = arith.constant 0 : index
    %36 = vector.load %arg9[%c0_19, %c0_20, %c0_21] : memref<1x8x128xf32, #tpu.memory_space<vmem>>, vector<1x8x128xf32>
    %37 = vector.shape_cast %36 : vector<1x8x128xf32> to vector<8x128xf32>
    %38 = vector.shape_cast %35 : vector<8x128xf32> to vector<1x8x128xf32>
    tpu.vector_store %arg9[%c0_19, %c0_20, %c0_21], %38 {strides = array<i32>} : memref<1x8x128xf32, #tpu.memory_space<vmem>>, vector<1x8x128xf32>,
    return
  }
  func.func @transform_0(%arg0: i32) -> (i32, i32, i32) {
    %c0_i32 = arith.constant 0 : i32
    %c0_i32_0 = arith.constant 0 : i32
    %c0_i32_1 = arith.constant 0 : i32
    return %arg0, %c0_i32, %c0_i32_0 : i32, i32, i32
  }
  func.func @transform_1(%arg0: i32) -> (i32, i32) {
    %c0_i32 = arith.constant 0 : i32
    %c0_i32_0 = arith.constant 0 : i32
    %c0_i32_1 = arith.constant 0 : i32
    return %c0_i32, %c0_i32_0 : i32, i32
  }
  func.func @transform_2(%arg0: i32) -> (i32, i32) {
    %c0_i32 = arith.constant 0 : i32
    %c0_i32_0 = arith.constant 0 : i32
    %c0_i32_1 = arith.constant 0 : i32
    return %c0_i32, %c0_i32_0 : i32, i32
  }
  func.func @transform_3(%arg0: i32) -> (i32, i32) {
    %c0_i32 = arith.constant 0 : i32
    %c0_i32_0 = arith.constant 0 : i32
    %c0_i32_1 = arith.constant 0 : i32
    return %c0_i32, %c0_i32_0 : i32, i32
  }
  func.func @transform_4(%arg0: i32) -> (i32, i32) {
    %c0_i32 = arith.constant 0 : i32
    %c0_i32_0 = arith.constant 0 : i32
    %c0_i32_1 = arith.constant 0 : i32
    return %c0_i32, %c0_i32_0 : i32, i32
  }
  func.func @transform_5(%arg0: i32) -> (i32, i32) {
    %c0_i32 = arith.constant 0 : i32
    %c0_i32_0 = arith.constant 0 : i32
    %c0_i32_1 = arith.constant 0 : i32
    return %c0_i32, %c0_i32_0 : i32, i32
  }
  func.func @transform_6(%arg0: i32) -> (i32, i32) {
    %c0_i32 = arith.constant 0 : i32
    %c0_i32_0 = arith.constant 0 : i32
    %c0_i32_1 = arith.constant 0 : i32
    return %c0_i32, %c0_i32_0 : i32, i32
  }
  func.func @transform_7(%arg0: i32) -> (i32, i32) {
    %c0_i32 = arith.constant 0 : i32
    %c0_i32_0 = arith.constant 0 : i32
    %c0_i32_1 = arith.constant 0 : i32
    return %c0_i32, %c0_i32_0 : i32, i32
  }
  func.func @transform_8(%arg0: i32) -> (i32, i32, i32) {
    %c0_i32 = arith.constant 0 : i32
    %c0_i32_0 = arith.constant 0 : i32
    %c0_i32_1 = arith.constant 0 : i32
    return %arg0, %c0_i32, %c0_i32_0 : i32, i32, i32
  }
}

</mosaic_0001>

<bundles_post_ra>
// kernel: tpu_custom_call.1
= control target key start
LH: loop header
LB: loop body
LE: loop exit
PB: predicated region body
PF: predicated region fallthrough
CT: control target
= control target key end

     0   :  { %13 = vsyncpa [#allocation3], 0  ;;  %s3305_s0 = inlined_call_operand.vmem [shape: f32[2,8,128], index: 0, kind: input, shape index: {}]   ;;  %s3306_s1 = inlined_call_operand.vmem [shape: f32[128,8], index: 1, kind: input, shape index: {}]   ;;  %s3307_s2 = inlined_call_operand.vmem [shape: f32[8,32], index: 2, kind: input, shape index: {}]   ;;  %s3308_s3 = inlined_call_operand.vmem [shape: f32[32,1], index: 3, kind: input, shape index: {}]   ;;  %s3309_s4 = inlined_call_operand.vmem [shape: f32[32,1], index: 4, kind: input, shape index: {}]   ;;  %s3310_s5 = inlined_call_operand.vmem [shape: f32[8,1], index: 5, kind: input, shape index: {}]   ;;  %s3311_s6 = inlined_call_operand.vmem [shape: f32[1,128], index: 6, kind: input, shape index: {}]   ;;  %s3312_s7 = inlined_call_operand.vmem [shape: f32[1,128], index: 7, kind: input, shape index: {}]   ;;  %s3313_s8 = inlined_call_operand.hbm [shape: f32[2,8,128], index: 8, kind: output, shape index: {}]  }
   0x1   :  { %15 = vsyncpa [#allocation3 + $0x1], 0  ;;  %s2808_s27 = smov 0   ;;  %s2810_s28 = smov 0  }
   0x2   :  { %s2812_s29 = smov 0   ;;  %s2814_s30 = smov 0  }
   0x3 LB: > { %s2829_s9 = sadd.s32 4294967295, %s2754_s30   ;;  %s2150_s10 = sadd.s32 4294967294, %s2754_s30   ;;  %s2754_s30 = sphi %s2814_s30, %s3319_s30   ;;  %s2750_s29 = sphi %s2812_s29, %s3318_s29   ;;  %s2746_s28 = sphi %s2810_s28, %s3317_s28   ;;  %s2742_s27 = sphi %s2808_s27, %s3316_s27  }
   0x4   : > { %s2833_s11 = sadd.s32 1, %s2754_s30   ;;  %s201_s12 = sadd.s32 1, %s2750_s29 }
   0x5   : > { %s198_s13 = ssub.s32 %s2754_s30, %s2833_s11  ;;  %p211_p0 = scmp.ne.s32.totalorder %s2750_s29, %s2746_s28 }
   0x6   : > { %p199_p1 = scmp.eq.s32.totalorder %s198_s13, 0  ;;  %p212_p2 = scmp.eq.s32.totalorder %s2829_s9, 1 }
   0x7   : > { %p217_p3 = scmp.ne.s32.totalorder %s2746_s28, %s2742_s27  ;;  %p218_p4 = scmp.eq.s32.totalorder %s2150_s10, 1 }
   0x8   : > { %s2844_s14 = scalar_select %p199_p1, %s2750_s29, %s201_s12  }
   0x9   : > { %p2846_p5 = por %p212_p2, %p211_p0  ;;  %p2850_p6 = por %p218_p4, %p217_p3 }
   0xa   : > { %p2153_p7 = scmp.ge.s32.totalorder %s2754_s30, 1  ;;  %p264_p8 = scmp.lt.s32.totalorder %s2754_s30, 3 }
   0xc   : > { %p265_p9 = pnand %p2153_p7, %p264_p8 }
   0xd   : > { %p297_p10 = scmp.lt.s32.totalorder (!%p265_p9), %s2829_s9, 1  ;;  %v302_v0 = vld [vmem:[%s3306_s1] sm:$0xff] (!%p265_p9)  ;;  %vm318_vm0 = vcmask (!%p265_p9), 64512   ;;  %v303_v1 = vld [vmem:[%s3306_s1 + $0x8] sm:$0xff] (!%p265_p9)  ;;  %v304_v2 = vld [vmem:[%s3306_s1 + $0x10] sm:$0xff] (!%p265_p9)  ;;  %s2757_s18 = smov (!%p265_p9), 1  }
   0xe   : > { %268 = sbr.rel (%p265_p9) target bundleno = 765 (0x2fd), region = 52  ;;  %v320_v3 = vsel (!%p265_p9), %vm318_vm0, %v302_v0, 0  ;;  %v323_v4 = vsel (!%p265_p9), %vm318_vm0, %v303_v1, 0  ;;  %v326_v5 = vsel (!%p265_p9), %vm318_vm0, %v304_v2, 0  ;;  %v305_v6 = vld [vmem:[%s3306_s1 + $0x18] sm:$0xff] (!%p265_p9)  ;;  %v306_v7 = vld [vmem:[%s3306_s1 + $0x20] sm:$0xff] (!%p265_p9) }
   0xf   : > { %v307_v8 = vld [vmem:[%s3306_s1 + $0x28] sm:$0xff] (!%p265_p9)  ;;  %v2879_v9 = vand.u32 (!%p265_p9), 4294901760, %v320_v3  ;;  %v2881_v10 = vand.u32 (!%p265_p9), 4294901760, %v323_v4  ;;  %v2883_v11 = vand.u32 (!%p265_p9), 4294901760, %v326_v5  ;;  %v329_v12 = vsel (!%p265_p9), %vm318_vm0, %v305_v6, 0  ;;  %v308_v13 = vld [vmem:[%s3306_s1 + $0x30] sm:$0xff] (!%p265_p9) }
  0x10   : > { %v2889_v14 = vand.u32 (!%p265_p9), 4294901760, %v329_v12  ;;  %v332_v15 = vsel (!%p265_p9), %vm318_vm0, %v306_v7, 0  ;;  %v335_v16 = vsel (!%p265_p9), %vm318_vm0, %v307_v8, 0  ;;  %v338_v17 = vsel (!%p265_p9), %vm318_vm0, %v308_v13, 0  ;;  %v309_v18 = vld [vmem:[%s3306_s1 + $0x38] sm:$0xff] (!%p265_p9)  ;;  %v310_v40 = vld [vmem:[%s3306_s1 + $0x40] sm:$0xff] (!%p265_p9) }
  0x11   : > { %v2898_v19 = vsub.f32 (!%p265_p9), %v320_v3, %v2879_v9  ;;  %v2901_v20 = vsub.f32 (!%p265_p9), %v323_v4, %v2881_v10  ;;  %v2904_v21 = vsub.f32 (!%p265_p9), %v326_v5, %v2883_v11  ;;  %v2906_v22 = vand.u32 (!%p265_p9), 4294901760, %v332_v15  ;;  %v311_v45 = vld [vmem:[%s3306_s1 + $0x48] sm:$0xff] (!%p265_p9)  ;;  %v312_v48 = vld [vmem:[%s3306_s1 + $0x50] sm:$0xff] (!%p265_p9)  ;;  %v313_v56 = vld [vmem:[%s3306_s1 + $0x58] sm:$0xff] (!%p265_p9)  ;;  %s2758_s19 = smov (!%p265_p9), 127   ;;  %s294_s12 = sand.u32 (!%p265_p9), 1, %s2746_s28  }
  0x12   : > { %v2912_v23 = vsub.f32 (!%p265_p9), %v329_v12, %v2889_v14  ;;  %v2914_v24 = vand.u32 (!%p265_p9), 4294901760, %v335_v16  ;;  %v2916_v25 = vand.u32 (!%p265_p9), 4294901760, %v338_v17  ;;  %v341_v26 = vsel (!%p265_p9), %vm318_vm0, %v309_v18, 0  ;;  %v314_v57 = vld [vmem:[%s3306_s1 + $0x60] sm:$0xff] (!%p265_p9)  ;;  %v315_v2 = vld [vmem:[%s3306_s1 + $0x68] sm:$0xff] (!%p265_p9)  ;;  %v316_v7 = vld [vmem:[%s3306_s1 + $0x70] sm:$0xff] (!%p265_p9) }
  0x13   : > { %2348 = vmatprep.mubr.f32.mxu0 (!%p265_p9), %v2898_v19  ;;  %v435_v28 = vand.u32 (!%p265_p9), 4294901760, %v2898_v19  ;;  %v445_v29 = vand.u32 (!%p265_p9), 4294901760, %v2901_v20  ;;  %v2923_v30 = vsub.f32 (!%p265_p9), %v332_v15, %v2906_v22  ;;  %v455_v31 = vand.u32 (!%p265_p9), 4294901760, %v2904_v21  ;;  %v317_v18 = vld [vmem:[%s3306_s1 + $0x78] sm:$0xff] (!%p265_p9)  ;;  %s2159_s17 = sshll.u32 (!%p265_p9), %s2829_s9, 7  ;;  %s2078_s23 = scalar_lea.sflag (!%p265_p9), [#allocation3], %s294_s12 }
  0x14   : > { %v2929_v33 = vsub.f32 (!%p265_p9), %v335_v16, %v2914_v24  ;;  %v465_v34 = vand.u32 (!%p265_p9), 4294901760, %v2912_v23  ;;  %v2933_v35 = vsub.f32 (!%p265_p9), %v338_v17, %v2916_v25  ;;  %v2944_v39 = vand.u32 (!%p265_p9), 4294901760, %v341_v26  ;;  %s3263_s22 = scalar_lea.hbm (!%p265_p9), %s3313_s8, %s2159_s17 }
  0x15   : > { %s298_s13 = scalar_select %p297_p10, %s2829_s9, 1  ;;  %v436_v36 = vsub.f32 %v2898_v19, %v435_v28  ;;  %v446_v37 = vsub.f32 %v2901_v20, %v445_v29  ;;  %v456_v38 = vsub.f32 %v2904_v21, %v455_v31  ;;  %v475_v43 = vand.u32 4294901760, %v2923_v30 }
  0x16   : > { %v466_v42 = vsub.f32 %v2912_v23, %v465_v34  ;;  %v485_v44 = vand.u32 4294901760, %v2929_v33  ;;  %v2963_v47 = vsub.f32 %v341_v26, %v2944_v39  ;;  %v344_v51 = vsel %vm318_vm0, %v310_v40, 0  ;;  %s2762_s9 = smov [#allocation2]  }
  0x17   : > { %s2155_s21 = sshll.u32 %s298_s13, 3  ;;  %v437_v46 = vand.u32 4294901760, %v436_v36  ;;  %v447_v49 = vand.u32 4294901760, %v446_v37  ;;  %v457_v50 = vand.u32 4294901760, %v456_v38  ;;  %v476_v52 = vsub.f32 %v2923_v30, %v475_v43  ;;  %s2154_s13 = sshll.u32 %s294_s12, 3 }
  0x18   : > { %s300_s24 = scalar_lea.vmem %s3305_s0, %s2155_s21  ;;  %v2974_v53 = vand.u32 4294901760, %v344_v51  ;;  %v347_v54 = vsel %vm318_vm0, %v311_v45, 0  ;;  %v495_v55 = vand.u32 4294901760, %v2933_v35  ;;  %v467_v58 = vand.u32 4294901760, %v466_v42  ;;  %s2696_s25 = sshll.u32 %s2762_s9, 4  ;;  %s2697_s25 = int_to_ptr.vmem [resolvable:$false] %s2696_s25 }
  0x19   : > { %v301_v27 = vld [vmem:[%s300_s24] sm:$0xff]  ;;  %2296 = vmatprep.mubr.f32.mxu1 %v437_v46  ;;  %v486_v59 = vsub.f32 %v2929_v33, %v485_v44  ;;  %v2989_v60 = vand.u32 4294901760, %v347_v54  ;;  %v350_v61 = vsel %vm318_vm0, %v312_v48, 0  ;;  %v505_v0 = vand.u32 4294901760, %v2963_v47  ;;  %s2698_s26 = scalar_lea.vmem %s2697_s25, 256 }
  0x1a   : > { %v2926_v32 = vand.u32 4294901760, %v301_v27  ;;  %v2995_v62 = vsub.f32 %v344_v51, %v2974_v53  ;;  %v496_v63 = vsub.f32 %v2933_v35, %v495_v55  ;;  %v3001_v1 = vand.u32 4294901760, %v350_v61 }
  0x1b   : > { %v3007_v3 = vsub.f32 %v347_v54, %v2989_v60  ;;  %v353_v4 = vsel %vm318_vm0, %v313_v56, 0  ;;  %v356_v6 = vsel %vm318_vm0, %v314_v57, 0  ;;  %v477_v8 = vand.u32 4294901760, %v476_v52 }
  0x1c   : > { %v2950_v41 = vsub.f32 %v301_v27, %v2926_v32  ;;  %2294 = vmatprep.subr.mxu1 %v2926_v32  ;;  %v3018_v12 = vsub.f32 %v350_v61, %v3001_v1  ;;  %v3020_v13 = vand.u32 4294901760, %v353_v4  ;;  %v515_v15 = vand.u32 4294901760, %v2995_v62 }
  0x1d   : > { %2295 = vmatpush3.msra.mxu1 %v2926_v32  ;;  %v3025_v16 = vand.u32 4294901760, %v356_v6  ;;  %v359_v17 = vsel %vm318_vm0, %v315_v2, 0  ;;  %v506_v26 = vsub.f32 %v2963_v47, %v505_v0  ;;  %v525_v36 = vand.u32 4294901760, %v3007_v3 }
  0x1e   : > { %2346 = vmatprep.subr.mxu0 %v2950_v41  ;;  %2297 = vmatmul.mubr.f32.vlgmr.msra.gmra.mrb[0].mxu1 %v447_v49  ;;  %v3011_v5 = vand.u32 4294901760, %v2950_v41  ;;  %v3036_v27 = vsub.f32 %v353_v4, %v3020_v13  ;;  %v362_v37 = vsel %vm318_vm0, %v316_v7, 0  ;;  %v487_v38 = vand.u32 4294901760, %v486_v59  ;;  %v1532_v59 = vld [vmem:[%s3309_s4] sm:$0xff] }
  0x1f   : > { %2347 = vmatpush3.msra.mxu0 %v2950_v41  ;;  %2299 = vmatprep.mubr.f32.mxu1 %v457_v50  ;;  %v497_v40 = vand.u32 4294901760, %v496_v63  ;;  %v535_v42 = vand.u32 4294901760, %v3018_v12  ;;  %v3041_v45 = vand.u32 4294901760, %v359_v17  ;;  %v516_v46 = vsub.f32 %v2995_v62, %v515_v15 }
  0x20   : > { %2349 = vmatmul.mubr.f32.vlgmr.msra.gmra.mrb[0].mxu0 %v2901_v20  ;;  %2372 = vmatprep.subr.mxu0 %v2926_v32  ;;  %v3047_v48 = vsub.f32 %v356_v6, %v3025_v16  ;;  %v3049_v49 = vand.u32 4294901760, %v362_v37  ;;  %v365_v50 = vsel %vm318_vm0, %v317_v18, 0  ;;  %v507_v51 = vand.u32 4294901760, %v506_v26 }
  0x21   : > { %2373 = vmatpush3.msra.mxu0 %v2926_v32  ;;  %2351 = vmatprep.mubr.f32.mxu0 %v2904_v21  ;;  %v526_v52 = vsub.f32 %v3007_v3, %v525_v36  ;;  %v545_v54 = vand.u32 4294901760, %v3036_v27  ;;  %v3059_v56 = vsub.f32 %v359_v17, %v3041_v45  ;;  %v3061_v57 = vand.u32 4294901760, %v365_v50 }
  0x22   : > { %2398 = vmatprep.subr.mxu0 %v3011_v5  ;;  %2300 = vmatmul.mubr.f32.gmra.mrb[2].mxu1 %v467_v58  ;;  %v597_v58 = vsub.f32 %v2950_v41, %v3011_v5  ;;  %v517_v61 = vand.u32 4294901760, %v516_v46  ;;  %v536_v63 = vsub.f32 %v3018_v12, %v535_v42  ;;  %v555_v2 = vand.u32 4294901760, %v3047_v48 }
  0x23   : > { %2302 = vmatprep.mubr.f32.mxu1 %v477_v8  ;;  %v3073_v4 = vsub.f32 %v362_v37, %v3049_v49  ;;  %v2756_v6 = vmov 0   ;;  %v527_v8 = vand.u32 4294901760, %v526_v52  ;;  %v546_v17 = vsub.f32 %v3036_v27, %v545_v54  ;;  %v1458_v37 = vld [vmem:[%s3308_s3] sm:$0xff] }
  0x24   : > { %2352 = vmatmul.mubr.f32.gmra.mrb[2].mxu0 %v2912_v23  ;;  %2691 = vset.pattern.permute.xlu1 %v2756_v6  ;;  %v598_v7 = vand.u32 4294901760, %v597_v58  ;;  %v565_v18 = vand.u32 4294901760, %v3059_v56  ;;  %v3082_v26 = vsub.f32 %v365_v50, %v3061_v57  ;;  %vm2760_vm1 = vmmov 0  }
  0x25   : > { %2354 = vmatprep.mubr.f32.mxu0 %v2923_v30  ;;  %2690 = vset.pattern.permute.xlu0 %v2756_v6  ;;  %v575_v46 = vand.u32 4294901760, %v3073_v4  ;;  %v547_v50 = vand.u32 4294901760, %v546_v17  ;;  %v1461_v6 = vld [vmem:[%s3308_s3 + $0x18] sm:$0xff]  ;;  %vm1587_vm2 = vcmask 261120  }
  0x26   : > { %2303 = vmatmul.mubr.f32.gmra.mrb[4].mxu1 %v487_v38  ;;  %1538 = vperm.xlu1 %2691, %v1532_v59   ;;  %v537_v38 = vand.u32 4294901760, %v536_v63  ;;  %v566_v52 = vsub.f32 %v3059_v56, %v565_v18  ;;  %v585_v58 = vand.u32 4294901760, %v3082_v26  ;;  %v1459_v59 = vld [vmem:[%s3308_s3 + $0x8] sm:$0xff] }
  0x27   : > { %2305 = vmatprep.mubr.f32.mxu1 %v497_v40  ;;  %2320 = vmatprep.subr.mxu1 %v598_v7  ;;  %v556_v40 = vsub.f32 %v3047_v48, %v555_v2  ;;  %v576_v63 = vsub.f32 %v3073_v4, %v575_v46 }
  0x28   : > { %2355 = vmatmul.mubr.f32.gmra.mrb[4].mxu0 %v2929_v33  ;;  %2321 = vmatpush3.msra.mxu1 %v598_v7  ;;  %v567_v7 = vand.u32 4294901760, %v566_v52 }
  0x29   : > { %2357 = vmatprep.mubr.f32.mxu0 %v2933_v35  ;;  %2552 = vmatprep.subr.mxu1 %v2950_v41  ;;  %v577_v17 = vand.u32 4294901760, %v576_v63 }
  0x2a   : > { %2306 = vmatmul.mubr.f32.gmra.mrb[6].mxu1 %v507_v51  ;;  %v1533_v51 = vld [vmem:[%s3309_s4 + $0x8] sm:$0xff]  ;;  %1464 = vperm.xlu0 %2690, %v1458_v37   ;;  %v1460_v37 = vld [vmem:[%s3308_s3 + $0x10] sm:$0xff] }
  0x2b   : > { %2308 = vmatprep.mubr.f32.mxu1 %v517_v61  ;;  %1543 = vperm.xlu1 %2691, %v1533_v51   ;;  %v557_v61 = vand.u32 4294901760, %v556_v40  ;;  %v1581_v51 = vld [vmem:[%s3310_s5] sm:$0xff] }
  0x2c   : > { %2358 = vmatmul.mubr.f32.gmra.mrb[6].mxu0 %v2963_v47 }
  0x2d   : > { %2360 = vmatprep.mubr.f32.mxu0 %v2995_v62 }
  0x2e   : > { %2309 = vmatmul.mubr.f32.gmra.mrb[8].mxu1 %v527_v8  ;;  %1469 = vperm.xlu0 %2690, %v1459_v59   ;;  %v586_v8 = vsub.f32 %v3082_v26, %v585_v58 }
  0x2f   : > { %2311 = vmatprep.mubr.f32.mxu1 %v537_v38  ;;  %1479 = vperm.xlu1 %2691, %v1461_v6  }
  0x30   : > { %2361 = vmatmul.mubr.f32.gmra.mrb[8].mxu0 %v3007_v3  ;;  %v587_v19 = vand.u32 4294901760, %v586_v8 }
  0x31   : > { %2363 = vmatprep.mubr.f32.mxu0 %v3018_v12 }
  0x32   : > { %2312 = vmatmul.mubr.f32.gmra.mrb[10].mxu1 %v547_v50  ;;  %1474 = vperm.xlu0 %2690, %v1460_v37   ;;  %v2761_v50 = vmov 0.0  }
  0x33   : > { %2314 = vmatprep.mubr.f32.mxu1 %v557_v61 }
  0x34   : > { %2364 = vmatmul.mubr.f32.gmra.mrb[10].mxu0 %v3036_v27 }
  0x35   : > { %2374 = vmatprep.mubr.f32.mxu0 %v435_v28 }
  0x36   : > { %2315 = vmatmul.mubr.f32.gmra.mrb[12].mxu1 %v567_v7 }
  0x37   : > { %2317 = vmatprep.mubr.f32.mxu1 %v577_v17 }
  0x38   : > { %2375 = vmatmul.mubr.f32.vlgmr.msra.gmra.mrb[0].mxu0 %v445_v29 }
  0x39   : > { %2399 = vmatpush3.msra.mxu0 %v3011_v5  ;;  %2377 = vmatprep.mubr.f32.mxu0 %v455_v31 }
  0x3a   : > { %2424 = vmatprep.subr.mxu0 %v2926_v32  ;;  %2318 = vmatmul.mubr.f32.gmra.mrb[14].mxu1 %v587_v19  ;;  %v2156_v19 = vld [vmem:[%s3311_s6] ss:$0 sm:$0xff] }
  0x3b   : > { %2322 = vmatprep.mubr.f32.mxu1 %v2879_v9 }
  0x3c   : > { %2378 = vmatmul.mubr.f32.gmra.mrb[2].mxu0 %v465_v34 }
  0x3d   : > { %2380 = vmatprep.mubr.f32.mxu0 %v475_v43 }
  0x3e   : > { %2323 = vmatmul.mubr.f32.vlgmr.msra.gmra.mrb[0].mxu1 %v2881_v10 }
  0x3f   : > { %2325 = vmatprep.mubr.f32.mxu1 %v2883_v11  ;;  %2553 = vmatpush3.msra.mxu1 %v2950_v41 }
  0x40   : > { %2381 = vmatmul.mubr.f32.gmra.mrb[4].mxu0 %v485_v44 }
  0x41   : > { %2383 = vmatprep.mubr.f32.mxu0 %v495_v55 }
  0x42   : > { %2326 = vmatmul.mubr.f32.gmra.mrb[2].mxu1 %v2889_v14 }
  0x43   : > { %2328 = vmatprep.mubr.f32.mxu1 %v2906_v22 }
  0x44   : > { %2384 = vmatmul.mubr.f32.gmra.mrb[6].mxu0 %v505_v0 }
  0x45   : > { %2386 = vmatprep.mubr.f32.mxu0 %v515_v15 }
  0x46   : > { %2329 = vmatmul.mubr.f32.gmra.mrb[4].mxu1 %v2914_v24 }
  0x47   : > { %2331 = vmatprep.mubr.f32.mxu1 %v2916_v25 }
  0x48   : > { %2387 = vmatmul.mubr.f32.gmra.mrb[8].mxu0 %v525_v36 }
  0x49   : > { %2389 = vmatprep.mubr.f32.mxu0 %v535_v42 }
  0x4a   : > { %2332 = vmatmul.mubr.f32.gmra.mrb[6].mxu1 %v2944_v39 }
  0x4b   : > { %2334 = vmatprep.mubr.f32.mxu1 %v2974_v53 }
  0x4c   : > { %2390 = vmatmul.mubr.f32.gmra.mrb[10].mxu0 %v545_v54 }
  0x4d   : > { %2392 = vmatprep.mubr.f32.mxu0 %v555_v2 }
  0x4e   : > { %2335 = vmatmul.mubr.f32.gmra.mrb[8].mxu1 %v2989_v60 }
  0x4f   : > { %2337 = vmatprep.mubr.f32.mxu1 %v3001_v1 }
  0x50   : > { %2393 = vmatmul.mubr.f32.gmra.mrb[12].mxu0 %v565_v18 }
  0x51   : > { %2395 = vmatprep.mubr.f32.mxu0 %v575_v46  ;;  %v2759_v46 = vmov 0.0|0.0  }
  0x52   : > { %2338 = vmatmul.mubr.f32.gmra.mrb[10].mxu1 %v3020_v13  ;;  %2516 = vmatprep.subr.bf16.mxu1 %v2759_v46 }
  0x53   : > { %2340 = vmatprep.mubr.f32.mxu1 %v3025_v16 }
  0x54   : > { %2396 = vmatmul.mubr.f32.gmra.mrb[14].mxu0 %v585_v58 }
  0x55   : > { %2400 = vmatprep.mubr.f32.mxu0 %v2879_v9 }
  0x56   : > { %2341 = vmatmul.mubr.f32.gmra.mrb[12].mxu1 %v3041_v45 }
  0x57   : > { %2343 = vmatprep.mubr.f32.mxu1 %v3049_v49 }
  0x58   : > { %2401 = vmatmul.mubr.f32.vlgmr.msra.gmra.mrb[0].mxu0 %v2881_v10 }
  0x59   : > { %2425 = vmatpush3.msra.mxu0 %v2926_v32  ;;  %2403 = vmatprep.mubr.f32.mxu0 %v2883_v11 }
  0x5a   : > { %2344 = vmatmul.mubr.f32.gmra.mrb[14].mxu1 %v3061_v57 }
  0x5b   : > { %2366 = vmatprep.mubr.f32.mxu1 %v3047_v48 }
  0x5c   : > { %2404 = vmatmul.mubr.f32.gmra.mrb[2].mxu0 %v2889_v14 }
  0x5d   : > { %2406 = vmatprep.mubr.f32.mxu0 %v2906_v22 }
  0x5e   : > { %2367 = vmatmul.mubr.f32.vlgmr.msra.gmra.mrb[12].mxu1 %v3059_v56 }
  0x5f   : > { %2369 = vmatprep.mubr.f32.mxu1 %v3073_v4 }
  0x60   : > { %2407 = vmatmul.mubr.f32.gmra.mrb[4].mxu0 %v2914_v24 }
  0x61   : > { %2409 = vmatprep.mubr.f32.mxu0 %v2916_v25 }
  0x62   : > { %2370 = vmatmul.mubr.f32.gmra.mrb[14].mxu1 %v3082_v26 }
  0x63   : > { %2458 = vmatprep.mubr.msk.f32.mxu1 %vm2760_vm1, %v2761_v50 }
  0x64   : > { %2410 = vmatmul.mubr.f32.gmra.mrb[6].mxu0 %v2944_v39 }
  0x65   : > { %2412 = vmatprep.mubr.f32.mxu0 %v2974_v53 }
  0x68   : > { %2413 = vmatmul.mubr.f32.gmra.mrb[8].mxu0 %v2989_v60 }
  0x69   : > { %2415 = vmatprep.mubr.f32.mxu0 %v3001_v1 }
  0x6c   : > { %2416 = vmatmul.mubr.f32.gmra.mrb[10].mxu0 %v3020_v13 }
  0x6d   : > { %2418 = vmatprep.mubr.f32.mxu0 %v3025_v16 }
  0x70   : > { %2419 = vmatmul.mubr.f32.gmra.mrb[12].mxu0 %v3041_v45 }
  0x71   : > { %2421 = vmatprep.mubr.f32.mxu0 %v3049_v49 }
  0x74   : > { %2422 = vmatmul.mubr.f32.gmra.mrb[14].mxu0 %v3061_v57 }
  0x75   : > { %2426 = vmatprep.mubr.f32.mxu0 %v2879_v9  ;;  %v1535_v9 = vld [vmem:[%s3309_s4 + $0x18] sm:$0xff] }
  0x76   : > { %1553 = vperm.xlu1 %2691, %v1535_v9  }
  0x78   : > { %2427 = vmatmul.mubr.f32.vlgmr.msra.gmra.mrb[0].mxu0 %v2881_v10  ;;  %v1534_v10 = vld [vmem:[%s3309_s4 + $0x10] sm:$0xff] }
  0x79   : > { %2429 = vmatprep.mubr.f32.mxu0 %v2883_v11  ;;  %1548 = vperm.xlu0 %2690, %v1534_v10  }
  0x7c   : > { %2430 = vmatmul.mubr.f32.gmra.mrb[2].mxu0 %v2889_v14 }
  0x7d   : > { %2432 = vmatprep.mubr.f32.mxu0 %v2906_v22 }
  0x80   : > { %2433 = vmatmul.mubr.f32.gmra.mrb[4].mxu0 %v2914_v24 }
  0x81   : > { %2435 = vmatprep.mubr.f32.mxu0 %v2916_v25 }
  0x84   : > { %2436 = vmatmul.mubr.f32.gmra.mrb[6].mxu0 %v2944_v39 }
  0x85   : > { %2438 = vmatprep.mubr.f32.mxu0 %v2974_v53 }
  0x88   : > { %2439 = vmatmul.mubr.f32.gmra.mrb[8].mxu0 %v2989_v60 }
  0x89   : > { %2441 = vmatprep.mubr.f32.mxu0 %v3001_v1 }
  0x8c   : > { %2442 = vmatmul.mubr.f32.gmra.mrb[10].mxu0 %v3020_v13 }
  0x8d   : > { %2444 = vmatprep.mubr.f32.mxu0 %v3025_v16 }
  0x90   : > { %2445 = vmatmul.mubr.f32.gmra.mrb[12].mxu0 %v3041_v45 }
  0x91   : > { %2447 = vmatprep.mubr.f32.mxu0 %v3049_v49 }
  0x94   : > { %2448 = vmatmul.mubr.f32.gmra.mrb[14].mxu0 %v3061_v57 }
  0xa5   : > { %v1539_v52 = vpop.permute.xlu1 %1538 }
  0xa9   : > { %v1465_v58 = vpop.permute.xlu0 %1464 }
  0xaa   : > { %v1544_v59 = vpop.permute.xlu1 %1543 }
  0xad   : > { %v1470_v61 = vpop.permute.xlu0 %1469 }
  0xae   : > { %v1480_v63 = vpop.permute.xlu1 %1479 }
  0xb1   : > { %v1475_v6 = vpop.permute.xlu0 %1474 }
  0xf5   : > { %v1554_v7 = vpop.permute.xlu1 %1553 }
  0xf8   : > { %v1549_v8 = vpop.permute.xlu0 %1548 }
 0x111   : > { %v2324_v11 = vpop.f32.mrb[0].mxu1 }
 0x112   : > { %v665_v14 = vpop.f32.mrb[1].mxu1 }
 0x115   : > { %v2327_v20 = vpop.f32.mrb[2].mxu1 }
 0x116   : > { %v677_v21 = vpop.f32.mrb[3].mxu1 }
 0x119   : > { %v2330_v22 = vpop.f32.mrb[4].mxu1 }
 0x11a   : > { %v689_v23 = vpop.f32.mrb[5].mxu1 }
 0x11d   : > { %v2333_v24 = vpop.f32.mrb[6].mxu1 }
 0x11e   : > { %v701_v25 = vpop.f32.mrb[7].mxu1 }
 0x121   : > { %v2336_v28 = vpop.f32.mrb[8].mxu1 }
 0x122   : > { %v713_v29 = vpop.f32.mrb[9].mxu1 }
 0x125   : > { %v2339_v30 = vpop.f32.mrb[10].mxu1 }
 0x126   : > { %v725_v31 = vpop.f32.mrb[11].mxu1 }
 0x131   : > { %v2368_v32 = vpop.f32.mrb[12].mxu1 }
 0x132   : > { %v913_v33 = vpop.f32.mrb[13].mxu1 }
 0x135   : > { %v2371_v34 = vpop.f32.mrb[14].mxu1 }
 0x136   : > { %v927_v35 = vpop.f32.mrb[15].mxu1 }
 0x14b   : > { %v2428_v39 = vpop.f32.mrb[0].mxu0 }
 0x14c   : > { %v3199_v41 = vadd.f32 %v2428_v39, %v2324_v11  ;;  %v1364_v43 = vpop.f32.mrb[1].mxu0 }
 0x14d   : > { %v3201_v44 = vadd.f32 %v1364_v43, %v665_v14 }
 0x14f   : > { %v2431_v47 = vpop.f32.mrb[2].mxu0 }
 0x150   : > { %v3203_v53 = vadd.f32 %v2431_v47, %v2327_v20  ;;  %v1376_v55 = vpop.f32.mrb[3].mxu0  ;;  %v2157_v20 = vld [vmem:[%s3312_s7] ss:$0 sm:$0xff] }
 0x151   : > { %v3205_v60 = vadd.f32 %v1376_v55, %v677_v21  ;;  %v1580_v21 = vld [vmem:[%s3307_s2] sm:$0xff] }
 0x152   : > { %v1485_v47 = vadd.f32 %v3203_v53, %v1480_v63 }
 0x153   : > { %v2434_v62 = vpop.f32.mrb[4].mxu0 }
 0x154   : > { %v2558_v0 = vadd.f32 %v2434_v62, %v2330_v22  ;;  %v1388_v1 = vpop.f32.mrb[5].mxu0  ;;  %v1482_v22 = vadd.f32 %v3201_v44, %v1465_v58  ;;  %v1571_v53 = vmax.f32 %v1485_v47, 0.0 }
 0x155   : > { %v2559_v3 = vadd.f32 %v1388_v1, %v689_v23  ;;  %v1483_v23 = vadd.f32 %v3199_v41, %v1470_v61 }
 0x156   : > { %1488 = vrot.lane.b32.xlu1 %v2558_v0, %s2757_s18  ;;  %v1568_v39 = vmax.f32 %v1482_v22, 0.0 }
 0x157   : > { %v2437_v5 = vpop.f32.mrb[6].mxu0  ;;  %1486 = vrot.lane.b32.xlu0 %v2559_v3, %s2757_s18  ;;  %v1569_v43 = vmax.f32 %v1483_v23, 0.0 }
 0x158   : > { %v2560_v12 = vadd.f32 %v2437_v5, %v2333_v24  ;;  %v1400_v13 = vpop.f32.mrb[7].mxu0  ;;  %v1484_v5 = vadd.f32 %v3205_v60, %v1475_v6 }
 0x159   : > { %v2561_v15 = vadd.f32 %v1400_v13, %v701_v25 }
 0x15a   : > { %1492 = vrot.lane.b32.xlu1 %v2560_v12, %s2757_s18 }
 0x15b   : > { %v2440_v16 = vpop.f32.mrb[8].mxu0  ;;  %1490 = vrot.lane.b32.xlu0 %v2561_v15, %s2757_s18  ;;  %s296_s18 = scalar_lea.vmem [#allocation2], %s2154_s13 }
 0x15c   : > { %v2562_v27 = vadd.f32 %v2440_v16, %v2336_v28  ;;  %v1412_v36 = vpop.f32.mrb[9].mxu0 }
 0x15d   : > { %v2563_v42 = vadd.f32 %v1412_v36, %v713_v29 }
 0x15f   : > { %v2443_v45 = vpop.f32.mrb[10].mxu0 }
 0x160   : > { %v2564_v48 = vadd.f32 %v2443_v45, %v2339_v30  ;;  %v1424_v49 = vpop.f32.mrb[11].mxu0 }
 0x161   : > { %v2565_v54 = vadd.f32 %v1424_v49, %v725_v31 }
 0x163   : > { %v2446_v56 = vpop.f32.mrb[12].mxu0 }
 0x164   : > { %v2566_v57 = vadd.f32 %v2446_v56, %v2368_v32  ;;  %v1436_v2 = vpop.f32.mrb[13].mxu0 }
 0x165   : > { %v2567_v4 = vadd.f32 %v1436_v2, %v913_v33  ;;  %v1570_v2 = vmax.f32 %v1484_v5, 0.0 }
 0x166   : > { %1507 = vrot.lane.b32.xlu1 %v2566_v57, %s2758_s19 }
 0x167   : > { %v2449_v18 = vpop.f32.mrb[14].mxu0  ;;  %1505 = vrot.lane.b32.xlu0 %v2567_v4, %s2758_s19 }
 0x168   : > { %v2568_v26 = vadd.f32 %v2449_v18, %v2371_v34  ;;  %v1448_v38 = vpop.f32.mrb[15].mxu0  ;;  %v1589_v34 = vsel %vm1587_vm2, %v1580_v21, 0 }
 0x169   : > { %v2569_v40 = vadd.f32 %v1448_v38, %v927_v35  ;;  %v3225_v3 = vand.u32 4294901760, %v1589_v34 }
 0x16a   : > { %1511 = vrot.lane.b32.xlu1 %v2568_v26, %s2758_s19 }
 0x16b   : > { %1509 = vrot.lane.b32.xlu0 %v2569_v40, %s2758_s19  ;;  %s2091_s19 = sshll.u32 %s296_s18, 4  ;;  %s3265_s19 = int_to_ptr.vmem [resolvable:$true] %s2091_s19 }
 0x16c   : > { %s2692_s24 = scalar_lea.vmem %s3265_s19, 128  ;;  %p2699_p0 = scmp.lt.s32.totalorder %s3265_s19, %s2697_s25 }
 0x16d   : > { %p2693_p11 = scmp.ne.s32.totalorder %s3265_s19, %s2692_s24  ;;  %p2700_p1 = scmp.lt.s32.totalorder %s2698_s26, %s2692_s24 }
 0x16f   : > { %1584 = vperm.xlu0 %2690, %v1581_v51   ;;  %p2694_p12 = pnand %p2693_p11, %p2846_p5  ;;  %p2701_p2 = por %p2700_p1, %p2699_p0 }
 0x171   : > { %p2695_p13 = pneg %p2694_p12 }
 0x173   : > { %p2702_p3 = pnand %p2701_p2, %p2695_p13 }
 0x1c8   : > { %v1489_v17 = vpop.permute.xlu1 %1488 }
 0x1c9   : > { %v1487_v37 = vpop.permute.xlu0 %1486  ;;  %v1502_v10 = vmul.f32 %v2156_v19, %v1489_v17 }
 0x1ca   : > { %v1501_v14 = vmul.f32 %v2156_v19, %v1487_v37 }
 0x1cb   : > { %v1525_v25 = vadd.f32 %v2562_v27, %v1502_v10 }
 0x1cc   : > { %v1493_v9 = vpop.permute.xlu1 %1492  ;;  %v1524_v31 = vadd.f32 %v2563_v42, %v1501_v14 }
 0x1cd   : > { %v1491_v11 = vpop.permute.xlu0 %1490  ;;  %v1504_v28 = vmul.f32 %v2156_v19, %v1493_v9 }
 0x1ce   : > { %v1503_v32 = vmul.f32 %v2156_v19, %v1491_v11 }
 0x1cf   : > { %v1527_v0 = vadd.f32 %v2564_v48, %v1504_v28  ;;  %v3229_v48 = vsub.f32 %v1589_v34, %v3225_v3 }
 0x1d0   : > { %v1526_v12 = vadd.f32 %v2565_v54, %v1503_v32 }
 0x1d8   : > { %v1508_v24 = vpop.permute.xlu1 %1507 }
 0x1d9   : > { %v1521_v29 = vmul.f32 %v2157_v20, %v1508_v24  ;;  %v1506_v30 = vpop.permute.xlu0 %1505 }
 0x1da   : > { %v1520_v33 = vmul.f32 %v2157_v20, %v1506_v30 }
 0x1db   : > { %v1529_v35 = vadd.f32 %v1525_v25, %v1521_v29 }
 0x1dc   : > { %v1528_v55 = vadd.f32 %v1524_v31, %v1520_v33  ;;  %v1512_v62 = vpop.permute.xlu1 %1511 }
 0x1dd   : > { %v1557_v44 = vadd.f32 %v1544_v59, %v1529_v35  ;;  %v1523_v1 = vmul.f32 %v2157_v20, %v1512_v62  ;;  %v1510_v41 = vpop.permute.xlu0 %1509  ;;  %v1662_v59 = vand.u32 4294901760, %v3229_v48 }
 0x1de   : > { %v1556_v13 = vadd.f32 %v1539_v52, %v1528_v55  ;;  %v1522_v15 = vmul.f32 %v2157_v20, %v1510_v41 }
 0x1df   : > { %v1561_v16 = vmax.f32 %v1557_v44, 0.0  ;;  %v1573_v27 = vmul.f32 %v1569_v43, %v1557_v44  ;;  %v1531_v36 = vadd.f32 %v1527_v0, %v1523_v1 }
 0x1e0   : > { %v1560_v42 = vmax.f32 %v1556_v13, 0.0  ;;  %v1572_v45 = vmul.f32 %v1568_v39, %v1556_v13  ;;  %v1530_v49 = vadd.f32 %v1526_v12, %v1522_v15 }
 0x1e1   : > { %v1565_v56 = vmul.f32 %v1561_v16, %v1483_v23  ;;  %v1559_v57 = vadd.f32 %v1554_v7, %v1531_v36 }
 0x1e2   : > { %v1564_v4 = vmul.f32 %v1560_v42, %v1482_v22  ;;  %v1558_v18 = vadd.f32 %v1549_v8, %v1530_v49  ;;  %v1663_v8 = vsub.f32 %v3229_v48, %v1662_v59 }
 0x1e3   : > { %v1577_v26 = vadd.f32 %v1573_v27, %v1565_v56  ;;  %v1563_v60 = vmax.f32 %v1559_v57, 0.0  ;;  %v1575_v54 = vmul.f32 %v1571_v53, %v1559_v57 }
 0x1e4   : > { %v1576_v38 = vadd.f32 %v1572_v45, %v1564_v4  ;;  %v1562_v40 = vmax.f32 %v1558_v18, 0.0  ;;  %v1574_v51 = vmul.f32 %v1570_v2, %v1558_v18  ;;  %v1664_v29 = vand.u32 4294901760, %v1663_v8 }
 0x1e5   : > { %v1567_v52 = vmul.f32 %v1563_v60, %v1485_v47  ;;  %v1595_v58 = vand.u32 4294901760, %v1577_v26 }
 0x1e6   : > { %v1566_v61 = vmul.f32 %v1562_v40, %v1484_v5  ;;  %v1592_v63 = vand.u32 4294901760, %v1576_v38 }
 0x1e7   : > { %v1579_v6 = vadd.f32 %v1575_v54, %v1567_v52  ;;  %v1679_v7 = vsub.f32 %v1577_v26, %v1595_v58 }
 0x1e8   : > { %v1578_v17 = vadd.f32 %v1574_v51, %v1566_v61  ;;  %v2517_v37 = vpack.c.bf16 %v1595_v58, %v1592_v63  ;;  %v1672_v19 = vsub.f32 %v1576_v38, %v1592_v63 }
 0x1e9   : > { %v1601_v9 = vand.u32 4294901760, %v1579_v6  ;;  %v1680_v10 = vand.u32 4294901760, %v1679_v7 }
 0x1ea   : > { %2518 = vmatpush3.bf16.msra.mxu1 %v2517_v37  ;;  %v1598_v11 = vand.u32 4294901760, %v1578_v17  ;;  %v1673_v14 = vand.u32 4294901760, %v1672_v19  ;;  %v2529_v20 = vpack.c.bf16 %v1679_v7, %v1672_v19 }
 0x1eb   : > { %2519 = vmatprep.subr.bf16.mxu1 %v2759_v46  ;;  %v1693_v21 = vsub.f32 %v1579_v6, %v1601_v9  ;;  %v1681_v22 = vsub.f32 %v1679_v7, %v1680_v10 }
 0x1ec   : > { %v2520_v23 = vpack.c.bf16 %v1601_v9, %v1598_v11  ;;  %v1686_v24 = vsub.f32 %v1578_v17, %v1598_v11  ;;  %v1674_v25 = vsub.f32 %v1672_v19, %v1673_v14  ;;  %v2541_v28 = vpack.c.bf16 %v1680_v10, %v1673_v14 }
 0x1ed   : > { %v1682_v30 = vand.u32 4294901760, %v1681_v22  ;;  %v1694_v31 = vand.u32 4294901760, %v1693_v21 }
 0x1ee   : > { %2521 = vmatpush3.bf16.msra.mxu1 %v2520_v23  ;;  %v1675_v32 = vand.u32 4294901760, %v1674_v25  ;;  %v1687_v33 = vand.u32 4294901760, %v1686_v24  ;;  %v2532_v34 = vpack.c.bf16 %v1693_v21, %v1686_v24  ;;  %v1585_v44 = vpop.permute.xlu0 %1584 }
 0x1ef   : > { %2522 = vmatprep.subr.bf16.mxu1 %v2759_v46  ;;  %v1695_v35 = vsub.f32 %v1693_v21, %v1694_v31 }
 0x1f0   : > { %v2523_v39 = vpack.c.bf16 %v1682_v30, %v1675_v32  ;;  %v1688_v43 = vsub.f32 %v1686_v24, %v1687_v33  ;;  %v2544_v47 = vpack.c.bf16 %v1694_v31, %v1687_v33 }
 0x1f1   : > { %2459 = vmatmul.mubr.f32.vlgmr.msra.gmra.mrb[16].mxu1 %v1664_v29  ;;  %v1696_v55 = vand.u32 4294901760, %v1695_v35 }
 0x1f2   : > { %2524 = vmatpush3.bf16.msra.mxu1 %v2523_v39  ;;  %v1689_v62 = vand.u32 4294901760, %v1688_v43  ;;  %2469 = vmatprep.mubr.msk.f32.mxu1 %vm2760_vm1, %v2761_v50 }
 0x1f3   : > { %2525 = vmatprep.subr.bf16.mxu1 %v2759_v46 }
 0x1f4   : > { %v2526_v0 = vpack.c.bf16 %v1696_v55, %v1689_v62 }
 0x1f6   : > { %2527 = vmatpush3.bf16.msra.mxu1 %v2526_v0 }
 0x1f7   : > { %2528 = vmatprep.subr.bf16.mxu1 %v2759_v46 }
 0x1f9   : > { %2470 = vmatmul.mubr.f32.vlgmr.msra.gmra.mrb[16].mxu1 %v3225_v3 }
 0x1fa   : > { %2530 = vmatpush3.bf16.msra.mxu1 %v2529_v20  ;;  %2480 = vmatprep.mubr.msk.f32.mxu1 %vm2760_vm1, %v2761_v50 }
 0x1fb   : > { %2531 = vmatprep.subr.bf16.mxu1 %v2759_v46 }
 0x1fe   : > { %2533 = vmatpush3.bf16.msra.mxu1 %v2532_v34 }
 0x1ff   : > { %2534 = vmatprep.subr.bf16.mxu1 %v2759_v46 }
 0x201   : > { %2481 = vmatmul.mubr.f32.vlgmr.msra.gmra.mrb[16].mxu1 %v3229_v48 }
 0x202   : > { %2536 = vmatpush3.bf16.msra.mxu1 %v2517_v37  ;;  %2491 = vmatprep.mubr.msk.f32.mxu1 %vm2760_vm1, %v2761_v50 }
 0x203   : > { %2537 = vmatprep.subr.bf16.mxu1 %v2759_v46 }
 0x206   : > { %2539 = vmatpush3.bf16.msra.mxu1 %v2520_v23 }
 0x207   : > { %2540 = vmatprep.subr.bf16.mxu1 %v2759_v46 }
 0x209   : > { %2492 = vmatmul.mubr.f32.vlgmr.msra.gmra.mrb[16].mxu1 %v1662_v59 }
 0x20a   : > { %2542 = vmatpush3.bf16.msra.mxu1 %v2541_v28  ;;  %2502 = vmatprep.mubr.msk.f32.mxu1 %vm2760_vm1, %v2761_v50 }
 0x20b   : > { %2543 = vmatprep.subr.bf16.mxu1 %v2759_v46 }
 0x20e   : > { %2545 = vmatpush3.bf16.msra.mxu1 %v2544_v47 }
 0x20f   : > { %2546 = vmatprep.subr.bf16.mxu1 %v2759_v46 }
 0x211   : > { %2503 = vmatmul.mubr.f32.vlgmr.msra.gmra.mrb[16].mxu1 %v3225_v3 }
 0x212   : > { %2548 = vmatpush3.bf16.msra.mxu1 %v2517_v37  ;;  %2513 = vmatprep.mubr.msk.f32.mxu1 %vm2760_vm1, %v2761_v50 }
 0x213   : > { %2549 = vmatprep.subr.bf16.mxu1 %v2759_v46 }
 0x216   : > { %2551 = vmatpush3.bf16.msra.mxu1 %v2520_v23 }
 0x219   : > { %2514 = vmatmul.mubr.f32.vlgmr.msra.gmra.mrb[16].mxu1 %v3225_v3 }
 0x2ec   : > { %v2072_v1 = vpop.f32.mrb[16].mxu1 }
 0x2ed   : > { %v2570_v41 = vadd.f32 %v2072_v1, %v1585_v44  ;;  %v2515_v5 = vpop.f32.mrb[17].mxu1 }
 0x2ef   : > { %2076 = vst [vmem:[%s296_s18] sm:$0xff] %v2570_v41 }
 0x2f0   : > { %2705 = shalt.err (!%p2702_p3)
}
 0x2f1   : > { %s2706_s10 = scalar_lea.hbm %s3263_s22, 128  ;;  %s2710_s17 = scalar_lea.hbm %s3313_s8, 256 }
 0x2f2   : > { %p2707_p4 = scmp.ne.s32.totalorder %s3263_s22, %s2706_s10  ;;  %p2711_p9 = scmp.lt.u32.totalorder %s3263_s22, %s3313_s8 }
 0x2f3   : > { %p2712_p10 = scmp.lt.u32.totalorder %s2710_s17, %s2706_s10  ;;  %p2714_p12 = scmp.lt.u32.totalorder %s2706_s10, %s3263_s22 }
 0x2f4   : > { %p2708_p7 = pnand %p2707_p4, %p2846_p5 }
 0x2f5   : > { %p2713_p11 = por %p2712_p10, %p2711_p9 }
 0x2f6   : > { %p2709_p8 = pneg %p2708_p7 }
 0x2f7   : > { %p2715_p13 = por %p2714_p12, %p2713_p11 }
 0x2f9   : > { %p2716_p0 = pnand %p2715_p13, %p2709_p8 }
 0x2fb   : > { %2719 = shalt.err (!%p2716_p0)
}
 0x2fc   : > { %2645 = dma.vmem_to_hbm [thread:$0]  (%p2846_p5), %s3265_s19, 128, %s3263_s22, %s2078_s23  }
 0x2fd PF: > { %p2651_p1 = scmp.ge.s32.totalorder %s2754_s30, 2  ;;  %s2103_s21 = sand.u32 1, %s2742_s27  }
 0x2fe   : > { %s2104_s24 = scalar_lea.sflag [#allocation3], %s2103_s21 }
 0x2ff   : > { %p2648_p2 = pnand %p2651_p1, %p2850_p6 }
 0x301   : > { %2737 = dma.done.wait (!%p2648_p2), %s2104_s24, 128  }
 0x302   : > { %2739 = vsyncadd (!%p2648_p2), %s2104_s24, 4294967168  ;;  %p18_p3 = scmp.ge.s32.totalorder %s2833_s11, 4   ;;  %s3316_s27 = smov %s2746_s28 }
 0x303   : > { %s3317_s28 = smov %s2750_s29  ;;  %s3318_s29 = smov %s2844_s14 }
 0x304   : > { %s3319_s30 = smov %s2833_s11  ;;  %20 = sbr.rel (!%p18_p3) target bundleno = 3 (0x3), region = 87 }
 0x30b   :  { %2109 = vsyncpa [#allocation3], 1 }
 0x30c   :  { %2111 = vsyncpa [#allocation3 + $0x1], 1 }

</bundles_post_ra>
